<compile_context>
chip_gen: v7x
topology: tpu7x:2x2x1
jax: 0.10.0
libtpu: 0.0.40
codegen_flags: <defaults>
</compile_context>

<pallas_src>
from functools import reduce
import operator

import jax
import jax.numpy as jnp
from jax.experimental import pallas as pl
from jax.experimental.pallas import tpu as pltpu

ARCHITECTURE_REGISTRY = {
    'cnn_huge':  {'kernel_size': [10, 10, 8, 4, 4, 4, 4], 'stride': [5, 5, 4, 2, 2, 2, 2], 'padding': [3, 3, 2, 1, 1, 1, 1]},
    'cnn_large': {'kernel_size': [10, 8, 4, 4, 4],        'stride': [5, 4, 2, 2, 2],       'padding': [3, 2, 1, 1, 1]},
    'cnn_small': {'kernel_size': [10, 4, 4, 4, 4],        'stride': [5, 2, 2, 2, 2],       'padding': [3, 1, 1, 1, 1]},
    'cnn_tiny':  {'kernel_size': [4, 4, 4, 4],            'stride': [2, 2, 2, 2],          'padding': [1, 1, 1, 1]},
}

BN_EPS = 1e-5
LANE = 128          # lane width
SUB = 8             # f32 sublanes per vreg
MAX_TILE_M = 512    # matmul-pass M tile cap
MAX_TILE_B = 2048   # BN/ReLU-pass M tile cap (pure mem-bound)
MAX_TILE_K = 1024   # contraction tile cap (keeps per-step VMEM small on v7x)


def _round_up(x, m):
    return ((x + m - 1) // m) * m


def _cdiv(a, b):
    return (a + b - 1) // b


def _vmem_limit_bytes():
    # v5e/v6e have 128 MiB physical VMEM -> raise the scoped limit there; keep a
    # conservative 32 MiB cap elsewhere (v7x only has 64 MiB physical).
    try:
        kind = jax.devices()[0].device_kind.lower()
    except Exception:
        kind = ""
    if "v5" in kind or "v6" in kind:
        return 64 * 1024 * 1024
    return 32 * 1024 * 1024


def _pick_tile_m(m, cap):
    """Largest multiple-of-16 tile <= cap minimizing padded rows plus ~64-row-
    equivalent per-grid-step overhead (avoids padding M up to a 512 multiple)."""
    hi = max(16, min(cap, _round_up(m, 16)))
    best_t, best_cost = 16, None
    for t in range(16, hi + 1, 16):
        m_pad = _round_up(m, t)
        cost = m_pad + 64 * (m_pad // t)
        if best_cost is None or cost <= best_cost:
            best_t, best_cost = t, cost
    return best_t


def conv_stats_kernel(p_ref, w_ref, y_ref, sum_ref, sq_ref, acc_ref):
    """Pass 1: conv-as-matmul. bf16 inputs, f32 accumulation across the K grid
    axis in a VMEM scratch. At the last K step: bf16 store of the conv tile plus
    per-M-tile partial channel sum / sum-of-squares taken from the f32
    accumulator (before the bf16 cast). No cross-M-tile accumulation, so the M
    grid axis can be "parallel" (megacore-sharded on v7x)."""
    k = pl.program_id(1)

    @pl.when(k == 0)
    def _():
        acc_ref[...] = jnp.zeros_like(acc_ref)

    acc_ref[...] += jnp.dot(p_ref[...], w_ref[...], preferred_element_type=jnp.float32)

    @pl.when(k == pl.num_programs(1) - 1)
    def _():
        acc = acc_ref[...]
        y_ref[...] = acc.astype(y_ref.dtype)                       # bf16 intermediate
        s = jnp.sum(acc, axis=0, keepdims=True)                    # stats from f32 acc
        q = jnp.sum(acc * acc, axis=0, keepdims=True)
        sum_ref[...] = jnp.broadcast_to(s, sum_ref.shape)
        sq_ref[...] = jnp.broadcast_to(q, sq_ref.shape)


def bn_relu_kernel(y_ref, scale_ref, shift_ref, o_ref):
    """Pass 2: folded BatchNorm affine + ReLU. bf16 in/out, f32 math in vregs."""
    y = y_ref[...].astype(jnp.float32)
    o_ref[...] = jnp.maximum(y * scale_ref[...] + shift_ref[...], 0.0).astype(o_ref.dtype)


def conv_bn_relu_layer(x_nlc, w, gamma, beta, stride, padding, vmem_limit):
    """x_nlc: (B, L, C_in) f32/bf16;  w: (C_out, C_in, K).
    Returns (B, L_out, C_out) bfloat16 (channels-last, for the next layer)."""
    B, L, C_in = x_nlc.shape
    C_out, _, K = w.shape
    L_out = (L + 2 * padding - K) // stride + 1

    M = B * L_out
    Kd = K * C_in
    Np = _round_up(C_out, LANE)                      # lane-dense output channels
    nk = _cdiv(_round_up(Kd, LANE), MAX_TILE_K)      # K grid steps (1 for small layers)
    tile_k = _round_up(_cdiv(_round_up(Kd, LANE), nk), LANE)
    Kp = tile_k * nk
    tile_m = _pick_tile_m(M, MAX_TILE_M)
    M_pad = _round_up(M, tile_m)
    n_tiles = M_pad // tile_m

    # --- XLA glue: im2col from channels-last, zero-padded, bf16 (half the HBM
    # traffic of the previous f32 version; inter-layer activations are bf16). ---
    # TODO(synk): gather patch tiles in-kernel (manual DMA from a pl.ANY-resident
    # input + scalar-prefetched row offsets) so the im2col matrix is never
    # materialized in HBM; likewise allow_input_fusion on the patches operand.
    x_p = jnp.pad(x_nlc.astype(jnp.bfloat16), ((0, 0), (padding, padding), (0, 0)))
    idx = jnp.arange(L_out)[:, None] * stride + jnp.arange(K)[None, :]      # (L_out, K)
    patches = x_p[:, idx, :].reshape(M, Kd)                                 # (M, K*C_in)
    patches = jnp.pad(patches, ((0, M_pad - M), (0, Kp - Kd)))

    # w[o, c, k] -> w2[k*C_in + c, o], zero-padded, bf16.
    w2 = jnp.transpose(w, (2, 1, 0)).reshape(Kd, C_out)
    w2 = jnp.pad(w2, ((0, Kp - Kd), (0, Np - C_out))).astype(jnp.bfloat16)

    cost_a = pl.CostEstimate(
        flops=2 * M_pad * Kp * Np,
        transcendentals=0,
        bytes_accessed=2 * M_pad * Kp + 2 * Kp * Np * n_tiles + 2 * M_pad * Np
                       + 8 * SUB * n_tiles * Np)

    y2d, part_sum, part_sq = pl.pallas_call(
        conv_stats_kernel,
        out_shape=(jax.ShapeDtypeStruct((M_pad, Np), jnp.bfloat16),
                   jax.ShapeDtypeStruct((SUB * n_tiles, Np), jnp.float32),
                   jax.ShapeDtypeStruct((SUB * n_tiles, Np), jnp.float32)),
        grid=(n_tiles, nk),
        in_specs=[pl.BlockSpec((tile_m, tile_k), lambda i, k: (i, k)),
                  pl.BlockSpec((tile_k, Np), lambda i, k: (k, 0))],
        out_specs=(pl.BlockSpec((tile_m, Np), lambda i, k: (i, 0)),
                   pl.BlockSpec((SUB, Np), lambda i, k: (i, 0)),
                   pl.BlockSpec((SUB, Np), lambda i, k: (i, 0))),
        scratch_shapes=[pltpu.VMEM((tile_m, Np), jnp.float32)],
        compiler_params=pltpu.CompilerParams(
            dimension_semantics=("parallel", "arbitrary"),   # M tiles megacore-shardable
            vmem_limit_bytes=vmem_limit),
        cost_estimate=cost_a,
    )(patches, w2)

    # --- tiny (1, Np) math in plain JAX: reduce per-tile partials, fold stats ---
    ch_sum = part_sum.reshape(n_tiles, SUB, Np)[:, 0, :].sum(axis=0, keepdims=True)
    ch_sq = part_sq.reshape(n_tiles, SUB, Np)[:, 0, :].sum(axis=0, keepdims=True)
    g_p = jnp.pad(gamma.reshape(1, C_out), ((0, 0), (0, Np - C_out)))
    b_p = jnp.pad(beta.reshape(1, C_out), ((0, 0), (0, Np - C_out)))
    mean = ch_sum / M                                    # padded rows are zero: divide by true M
    var = jnp.maximum(ch_sq / M - mean * mean, 0.0)      # biased variance (train-mode BN)
    inv = jax.lax.rsqrt(var + BN_EPS)
    scale = g_p * inv
    shift = b_p - mean * scale

    # --- pass 2: BN affine + ReLU, large tiles, in-place over y2d (aliased) ---
    grow = 1
    for d in range(1, n_tiles + 1):
        if n_tiles % d == 0 and tile_m * d <= MAX_TILE_B:
            grow = d
    tile_b = tile_m * grow

    cost_b = pl.CostEstimate(
        flops=3 * M_pad * Np,
        transcendentals=0,
        bytes_accessed=4 * M_pad * Np + 8 * Np)

    out2d = pl.pallas_call(
        bn_relu_kernel,
        out_shape=jax.ShapeDtypeStruct((M_pad, Np), jnp.bfloat16),
        grid=(M_pad // tile_b,),
        in_specs=[pl.BlockSpec((tile_b, Np), lambda i: (i, 0)),
                  pl.BlockSpec((1, Np), lambda i: (0, 0)),
                  pl.BlockSpec((1, Np), lambda i: (0, 0))],
        out_specs=pl.BlockSpec((tile_b, Np), lambda i: (i, 0)),
        input_output_aliases={0: 0},                     # overwrite y2d in place
        compiler_params=pltpu.CompilerParams(
            dimension_semantics=("parallel",),
            vmem_limit_bytes=vmem_limit),
        cost_estimate=cost_b,
    )(y2d, scale, shift)

    # Slice off padded rows/channels; stay bf16 channels-last for the next layer.
    return out2d[:M, :C_out].reshape(B, L_out, C_out)


class CNNEncoderPallas:
    """JAX/Pallas port of the PyTorch CNNEncoder (fresh, training-mode BatchNorm)."""

    def __init__(self, size, in_channels, architecture_key, key):
        self.size = size
        self.in_channels = in_channels
        self.params = ARCHITECTURE_REGISTRY[architecture_key]
        self.layers = len(self.params['kernel_size'])
        self.weights = []
        for i in range(self.layers):
            cin = in_channels if i == 0 else size
            k = self.params['kernel_size'][i]
            key, sub = jax.random.split(key)
            # PyTorch Conv1d default init: U(-1/sqrt(cin*k), 1/sqrt(cin*k))
            bound = 1.0 / float(cin * k) ** 0.5
            w = jax.random.uniform(sub, (size, cin, k), jnp.float32, -bound, bound)
            gamma = jnp.ones((size,), jnp.float32)   # BN weight init
            beta = jnp.zeros((size,), jnp.float32)   # BN bias init
            self.weights.append((w, gamma, beta))
        self._vmem_limit = _vmem_limit_bytes()
        self._forward = jax.jit(self._forward_impl)

    def _forward_impl(self, x, weights):
        x = jnp.transpose(x.astype(jnp.float32), (0, 2, 1))      # NCL -> NLC once
        for i in range(self.layers):
            w, g, b = weights[i]
            x = conv_bn_relu_layer(
                x, w, g, b,
                stride=self.params['stride'][i],
                padding=self.params['padding'][i],
                vmem_limit=self._vmem_limit)
        # NLC -> NCL once; single cast of the (bf16) result back to f32.
        return jnp.transpose(x, (0, 2, 1)).astype(jnp.float32)

    def __call__(self, x):
        return self._forward(x, self.weights)

    @property
    def downsample_factor(self):
        return reduce(operator.mul, self.params['stride'])


def reference_forward(model, x):
    """Pure-JAX reference matching the kernel's data path: bf16 conv inputs /
    f32 MXU accumulation, f32 batch stats, bf16 conv intermediate fed to the BN
    affine, bf16 inter-layer activations, f32 at the very end."""
    x = x.astype(jnp.float32)
    for i in range(model.layers):
        w, g, b = model.weights[i]
        s = model.params['stride'][i]
        p = model.params['padding'][i]
        y = jax.lax.conv_general_dilated(
            x.astype(jnp.bfloat16), w.astype(jnp.bfloat16),
            window_strides=(s,), padding=[(p, p)],
            dimension_numbers=('NCH', 'OIH', 'NCH'),
            preferred_element_type=jnp.float32)
        mean = jnp.mean(y, axis=(0, 2), keepdims=True)                 # stats in f32
        var = jnp.mean((y - mean) ** 2, axis=(0, 2), keepdims=True)
        scale = g[None, :, None] * jax.lax.rsqrt(var + BN_EPS)
        shift = b[None, :, None] - mean * scale
        y_q = y.astype(jnp.bfloat16).astype(jnp.float32)               # bf16 intermediate
        x = jnp.maximum(y_q * scale + shift, 0.0).astype(jnp.bfloat16)  # bf16 activations
    return x.astype(jnp.float32)


if __name__ == "__main__":
    key = jax.random.PRNGKey(0)
    k_param, k_input = jax.random.split(key)

    batch, in_channels, length, size = 2, 4, 64, 32
    model = CNNEncoderPallas(size=size, in_channels=in_channels,
                             architecture_key='cnn_tiny', key=k_param)

    x = jax.random.normal(k_input, (batch, in_channels, length), jnp.float32)

    out = jax.block_until_ready(model(x))
    ref = jax.block_until_ready(reference_forward(model, x))

    assert out.shape == ref.shape == (batch, size, length // model.downsample_factor)
    # bf16 activation storage on both paths: allow 1-ulp (~0.8% relative) rounding
    # boundary differences element-wise, and check aggregate drift is tiny.
    assert jnp.allclose(out, ref, rtol=1e-2, atol=1e-2), "mismatch vs JAX reference"
    assert float(jnp.mean(jnp.abs(out - ref))) < 2e-3, "mean drift vs JAX reference"

    print("KERNEL_OK")
</pallas_src>

<mosaic_0001>
module attributes {stable_mosaic.version = 11 : i64} {
  func.func @conv_stats_kernel(%arg0: i32, %arg1: i32, %arg2: memref<64x128xbf16, #tpu.memory_space<vmem>>, %arg3: memref<128x128xbf16, #tpu.memory_space<vmem>>, %arg4: memref<64x128xbf16, #tpu.memory_space<vmem>>, %arg5: memref<8x128xf32, #tpu.memory_space<vmem>>, %arg6: memref<8x128xf32, #tpu.memory_space<vmem>>, %arg7: memref<64x128xf32, #tpu.memory_space<vmem>>) attributes {dimension_semantics = [#tpu.dimension_semantics<parallel>, #tpu.dimension_semantics<arbitrary>], iteration_bounds = array<i64: 1, 1>, scalar_prefetch = 0 : i64, scratch_operands = 1 : i64, tpu.core_type = #tpu.core_type<tc>, window_params = [{transform_indices = @transform_0, window_bounds = array<i64: 64, 128>}, {transform_indices = @transform_1, window_bounds = array<i64: 128, 128>}, {transform_indices = @transform_2, window_bounds = array<i64: 64, 128>}, {transform_indices = @transform_3, window_bounds = array<i64: 8, 128>}, {transform_indices = @transform_4, window_bounds = array<i64: 8, 128>}]} {
    %c0_i32 = arith.constant 0 : i32
    %0 = arith.cmpi eq, %arg1, %c0_i32 : i32
    %1 = arith.extui %0 : i1 to i32
    %c0_i32_0 = arith.constant 0 : i32
    %2 = arith.cmpi ne, %1, %c0_i32_0 : i32
    scf.if %2 {
      %cst_10 = arith.constant 0.000000e+00 : f32
      %12 = vector.broadcast %cst_10 : f32 to vector<64x128xf32>
      %c0_11 = arith.constant 0 : index
      %c0_12 = arith.constant 0 : index
      %13 = vector.load %arg7[%c0_11, %c0_12] : memref<64x128xf32, #tpu.memory_space<vmem>>, vector<64x128xf32>
      tpu.vector_store %arg7[%c0_11, %c0_12], %12 {strides = array<i32>} : memref<64x128xf32, #tpu.memory_space<vmem>>, vector<64x128xf32>,
    } else {
    }
    %c0 = arith.constant 0 : index
    %c0_1 = arith.constant 0 : index
    %3 = vector.load %arg7[%c0, %c0_1] : memref<64x128xf32, #tpu.memory_space<vmem>>, vector<64x128xf32>
    %c0_2 = arith.constant 0 : index
    %c0_3 = arith.constant 0 : index
    %4 = vector.load %arg2[%c0_2, %c0_3] : memref<64x128xbf16, #tpu.memory_space<vmem>>, vector<64x128xbf16>
    %c0_4 = arith.constant 0 : index
    %c0_5 = arith.constant 0 : index
    %5 = vector.load %arg3[%c0_4, %c0_5] : memref<128x128xbf16, #tpu.memory_space<vmem>>, vector<128x128xbf16>
    %cst = arith.constant dense<0.000000e+00> : vector<64x128xf32>
    %6 = tpu.matmul %4, %5, %cst {dimension_numbers = #tpu.dot_dimension_numbers<[1], [0], [0], [1], [0, 0, 1, 1], [], []>} : vector<64x128xbf16>, vector<128x128xbf16>, vector<64x128xf32> -> vector<64x128xf32>
    %7 = arith.addf %3, %6 : vector<64x128xf32>
    %c0_6 = arith.constant 0 : index
    %c0_7 = arith.constant 0 : index
    %8 = vector.load %arg7[%c0_6, %c0_7] : memref<64x128xf32, #tpu.memory_space<vmem>>, vector<64x128xf32>
    tpu.vector_store %arg7[%c0_6, %c0_7], %7 {strides = array<i32>} : memref<64x128xf32, #tpu.memory_space<vmem>>, vector<64x128xf32>,
    %c0_i32_8 = arith.constant 0 : i32
    %9 = arith.cmpi eq, %arg1, %c0_i32_8 : i32
    %10 = arith.extui %9 : i1 to i32
    %c0_i32_9 = arith.constant 0 : i32
    %11 = arith.cmpi ne, %10, %c0_i32_9 : i32
    scf.if %11 {
      %c0_10 = arith.constant 0 : index
      %c0_11 = arith.constant 0 : index
      %12 = vector.load %arg7[%c0_10, %c0_11] : memref<64x128xf32, #tpu.memory_space<vmem>>, vector<64x128xf32>
      %13 = arith.truncf %12 : vector<64x128xf32> to vector<64x128xbf16>
      %c0_12 = arith.constant 0 : index
      %c0_13 = arith.constant 0 : index
      %14 = vector.load %arg4[%c0_12, %c0_13] : memref<64x128xbf16, #tpu.memory_space<vmem>>, vector<64x128xbf16>
      tpu.vector_store %arg4[%c0_12, %c0_13], %13 {strides = array<i32>} : memref<64x128xbf16, #tpu.memory_space<vmem>>, vector<64x128xbf16>,
      %cst_14 = arith.constant dense<0.000000e+00> : vector<128xf32>
      %15 = vector.multi_reduction <add>, %12, %cst_14 [0] : vector<64x128xf32> to vector<128xf32>
      %16 = vector.shape_cast %15 : vector<128xf32> to vector<1x128xf32>
      %17 = arith.mulf %12, %12 : vector<64x128xf32>
      %cst_15 = arith.constant dense<0.000000e+00> : vector<128xf32>
      %18 = vector.multi_reduction <add>, %17, %cst_15 [0] : vector<64x128xf32> to vector<128xf32>
      %19 = vector.shape_cast %18 : vector<128xf32> to vector<1x128xf32>
      %20 = vector.shape_cast %16 : vector<1x128xf32> to vector<1x128xf32>
      %21 = vector.broadcast %20 : vector<1x128xf32> to vector<8x128xf32>
      %c0_16 = arith.constant 0 : index
      %c0_17 = arith.constant 0 : index
      %22 = vector.load %arg5[%c0_16, %c0_17] : memref<8x128xf32, #tpu.memory_space<vmem>>, vector<8x128xf32>
      tpu.vector_store %arg5[%c0_16, %c0_17], %21 {strides = array<i32>} : memref<8x128xf32, #tpu.memory_space<vmem>>, vector<8x128xf32>,
      %23 = vector.shape_cast %19 : vector<1x128xf32> to vector<1x128xf32>
      %24 = vector.broadcast %23 : vector<1x128xf32> to vector<8x128xf32>
      %c0_18 = arith.constant 0 : index
      %c0_19 = arith.constant 0 : index
      %25 = vector.load %arg6[%c0_18, %c0_19] : memref<8x128xf32, #tpu.memory_space<vmem>>, vector<8x128xf32>
      tpu.vector_store %arg6[%c0_18, %c0_19], %24 {strides = array<i32>} : memref<8x128xf32, #tpu.memory_space<vmem>>, vector<8x128xf32>,
    } else {
    }
    return
  }
  func.func @transform_0(%arg0: i32, %arg1: i32) -> (i32, i32) {
    %c0_i32 = arith.constant 0 : i32
    return %arg0, %arg1 : i32, i32
  }
  func.func @transform_1(%arg0: i32, %arg1: i32) -> (i32, i32) {
    %c0_i32 = arith.constant 0 : i32
    %c0_i32_0 = arith.constant 0 : i32
    return %arg1, %c0_i32 : i32, i32
  }
  func.func @transform_2(%arg0: i32, %arg1: i32) -> (i32, i32) {
    %c0_i32 = arith.constant 0 : i32
    %c0_i32_0 = arith.constant 0 : i32
    return %arg0, %c0_i32 : i32, i32
  }
  func.func @transform_3(%arg0: i32, %arg1: i32) -> (i32, i32) {
    %c0_i32 = arith.constant 0 : i32
    %c0_i32_0 = arith.constant 0 : i32
    return %arg0, %c0_i32 : i32, i32
  }
  func.func @transform_4(%arg0: i32, %arg1: i32) -> (i32, i32) {
    %c0_i32 = arith.constant 0 : i32
    %c0_i32_0 = arith.constant 0 : i32
    return %arg0, %c0_i32 : i32, i32
  }
}

module attributes {stable_mosaic.version = 11 : i64} {
  func.func @bn_relu_kernel(%arg0: i32, %arg1: memref<64x128xbf16, #tpu.memory_space<vmem>>, %arg2: memref<1x128xf32, #tpu.memory_space<vmem>>, %arg3: memref<1x128xf32, #tpu.memory_space<vmem>>, %arg4: memref<64x128xbf16, #tpu.memory_space<vmem>>) attributes {dimension_semantics = [#tpu.dimension_semantics<parallel>], iteration_bounds = array<i64: 1>, scalar_prefetch = 0 : i64, scratch_operands = 0 : i64, tpu.core_type = #tpu.core_type<tc>, window_params = [{transform_indices = @transform_0, window_bounds = array<i64: 64, 128>}, {pipeline_mode = #tpu.pipeline_mode<synchronous>, transform_indices = @transform_1, window_bounds = array<i64: 1, 128>}, {pipeline_mode = #tpu.pipeline_mode<synchronous>, transform_indices = @transform_2, window_bounds = array<i64: 1, 128>}, {transform_indices = @transform_3, window_bounds = array<i64: 64, 128>}]} {
    %c0 = arith.constant 0 : index
    %c0_0 = arith.constant 0 : index
    %0 = vector.load %arg1[%c0, %c0_0] : memref<64x128xbf16, #tpu.memory_space<vmem>>, vector<64x128xbf16>
    %1 = arith.extf %0 : vector<64x128xbf16> to vector<64x128xf32>
    %c0_1 = arith.constant 0 : index
    %c0_2 = arith.constant 0 : index
    %2 = vector.load %arg2[%c0_1, %c0_2] : memref<1x128xf32, #tpu.memory_space<vmem>>, vector<1x128xf32>
    %3 = vector.broadcast %2 : vector<1x128xf32> to vector<64x128xf32>
    %4 = arith.mulf %1, %3 : vector<64x128xf32>
    %c0_3 = arith.constant 0 : index
    %c0_4 = arith.constant 0 : index
    %5 = vector.load %arg3[%c0_3, %c0_4] : memref<1x128xf32, #tpu.memory_space<vmem>>, vector<1x128xf32>
    %6 = vector.broadcast %5 : vector<1x128xf32> to vector<64x128xf32>
    %7 = arith.addf %4, %6 : vector<64x128xf32>
    %cst = arith.constant 0.000000e+00 : f32
    %8 = vector.broadcast %cst : f32 to vector<64x128xf32>
    %9 = arith.maximumf %7, %8 : vector<64x128xf32>
    %10 = arith.truncf %9 : vector<64x128xf32> to vector<64x128xbf16>
    %c0_5 = arith.constant 0 : index
    %c0_6 = arith.constant 0 : index
    %11 = vector.load %arg4[%c0_5, %c0_6] : memref<64x128xbf16, #tpu.memory_space<vmem>>, vector<64x128xbf16>
    tpu.vector_store %arg4[%c0_5, %c0_6], %10 {strides = array<i32>} : memref<64x128xbf16, #tpu.memory_space<vmem>>, vector<64x128xbf16>,
    return
  }
  func.func @transform_0(%arg0: i32) -> (i32, i32) {
    %c0_i32 = arith.constant 0 : i32
    %c0_i32_0 = arith.constant 0 : i32
    return %arg0, %c0_i32 : i32, i32
  }
  func.func @transform_1(%arg0: i32) -> (i32, i32) {
    %c0_i32 = arith.constant 0 : i32
    %c0_i32_0 = arith.constant 0 : i32
    %c0_i32_1 = arith.constant 0 : i32
    return %c0_i32, %c0_i32_0 : i32, i32
  }
  func.func @transform_2(%arg0: i32) -> (i32, i32) {
    %c0_i32 = arith.constant 0 : i32
    %c0_i32_0 = arith.constant 0 : i32
    %c0_i32_1 = arith.constant 0 : i32
    return %c0_i32, %c0_i32_0 : i32, i32
  }
  func.func @transform_3(%arg0: i32) -> (i32, i32) {
    %c0_i32 = arith.constant 0 : i32
    %c0_i32_0 = arith.constant 0 : i32
    return %arg0, %c0_i32 : i32, i32
  }
}

module attributes {stable_mosaic.version = 11 : i64} {
  func.func @bn_relu_kernel(%arg0: i32, %arg1: memref<32x128xbf16, #tpu.memory_space<vmem>>, %arg2: memref<1x128xf32, #tpu.memory_space<vmem>>, %arg3: memref<1x128xf32, #tpu.memory_space<vmem>>, %arg4: memref<32x128xbf16, #tpu.memory_space<vmem>>) attributes {dimension_semantics = [#tpu.dimension_semantics<parallel>], iteration_bounds = array<i64: 1>, scalar_prefetch = 0 : i64, scratch_operands = 0 : i64, tpu.core_type = #tpu.core_type<tc>, window_params = [{transform_indices = @transform_0, window_bounds = array<i64: 32, 128>}, {pipeline_mode = #tpu.pipeline_mode<synchronous>, transform_indices = @transform_1, window_bounds = array<i64: 1, 128>}, {pipeline_mode = #tpu.pipeline_mode<synchronous>, transform_indices = @transform_2, window_bounds = array<i64: 1, 128>}, {transform_indices = @transform_3, window_bounds = array<i64: 32, 128>}]} {
    %c0 = arith.constant 0 : index
    %c0_0 = arith.constant 0 : index
    %0 = vector.load %arg1[%c0, %c0_0] : memref<32x128xbf16, #tpu.memory_space<vmem>>, vector<32x128xbf16>
    %1 = arith.extf %0 : vector<32x128xbf16> to vector<32x128xf32>
    %c0_1 = arith.constant 0 : index
    %c0_2 = arith.constant 0 : index
    %2 = vector.load %arg2[%c0_1, %c0_2] : memref<1x128xf32, #tpu.memory_space<vmem>>, vector<1x128xf32>
    %3 = vector.broadcast %2 : vector<1x128xf32> to vector<32x128xf32>
    %4 = arith.mulf %1, %3 : vector<32x128xf32>
    %c0_3 = arith.constant 0 : index
    %c0_4 = arith.constant 0 : index
    %5 = vector.load %arg3[%c0_3, %c0_4] : memref<1x128xf32, #tpu.memory_space<vmem>>, vector<1x128xf32>
    %6 = vector.broadcast %5 : vector<1x128xf32> to vector<32x128xf32>
    %7 = arith.addf %4, %6 : vector<32x128xf32>
    %cst = arith.constant 0.000000e+00 : f32
    %8 = vector.broadcast %cst : f32 to vector<32x128xf32>
    %9 = arith.maximumf %7, %8 : vector<32x128xf32>
    %10 = arith.truncf %9 : vector<32x128xf32> to vector<32x128xbf16>
    %c0_5 = arith.constant 0 : index
    %c0_6 = arith.constant 0 : index
    %11 = vector.load %arg4[%c0_5, %c0_6] : memref<32x128xbf16, #tpu.memory_space<vmem>>, vector<32x128xbf16>
    tpu.vector_store %arg4[%c0_5, %c0_6], %10 {strides = array<i32>} : memref<32x128xbf16, #tpu.memory_space<vmem>>, vector<32x128xbf16>,
    return
  }
  func.func @transform_0(%arg0: i32) -> (i32, i32) {
    %c0_i32 = arith.constant 0 : i32
    %c0_i32_0 = arith.constant 0 : i32
    return %arg0, %c0_i32 : i32, i32
  }
  func.func @transform_1(%arg0: i32) -> (i32, i32) {
    %c0_i32 = arith.constant 0 : i32
    %c0_i32_0 = arith.constant 0 : i32
    %c0_i32_1 = arith.constant 0 : i32
    return %c0_i32, %c0_i32_0 : i32, i32
  }
  func.func @transform_2(%arg0: i32) -> (i32, i32) {
    %c0_i32 = arith.constant 0 : i32
    %c0_i32_0 = arith.constant 0 : i32
    %c0_i32_1 = arith.constant 0 : i32
    return %c0_i32, %c0_i32_0 : i32, i32
  }
  func.func @transform_3(%arg0: i32) -> (i32, i32) {
    %c0_i32 = arith.constant 0 : i32
    %c0_i32_0 = arith.constant 0 : i32
    return %arg0, %c0_i32 : i32, i32
  }
}

module attributes {stable_mosaic.version = 11 : i64} {
  func.func @conv_stats_kernel(%arg0: i32, %arg1: i32, %arg2: memref<32x128xbf16, #tpu.memory_space<vmem>>, %arg3: memref<128x128xbf16, #tpu.memory_space<vmem>>, %arg4: memref<32x128xbf16, #tpu.memory_space<vmem>>, %arg5: memref<8x128xf32, #tpu.memory_space<vmem>>, %arg6: memref<8x128xf32, #tpu.memory_space<vmem>>, %arg7: memref<32x128xf32, #tpu.memory_space<vmem>>) attributes {dimension_semantics = [#tpu.dimension_semantics<parallel>, #tpu.dimension_semantics<arbitrary>], iteration_bounds = array<i64: 1, 1>, scalar_prefetch = 0 : i64, scratch_operands = 1 : i64, tpu.core_type = #tpu.core_type<tc>, window_params = [{transform_indices = @transform_0, window_bounds = array<i64: 32, 128>}, {transform_indices = @transform_1, window_bounds = array<i64: 128, 128>}, {transform_indices = @transform_2, window_bounds = array<i64: 32, 128>}, {transform_indices = @transform_3, window_bounds = array<i64: 8, 128>}, {transform_indices = @transform_4, window_bounds = array<i64: 8, 128>}]} {
    %c0_i32 = arith.constant 0 : i32
    %0 = arith.cmpi eq, %arg1, %c0_i32 : i32
    %1 = arith.extui %0 : i1 to i32
    %c0_i32_0 = arith.constant 0 : i32
    %2 = arith.cmpi ne, %1, %c0_i32_0 : i32
    scf.if %2 {
      %cst_10 = arith.constant 0.000000e+00 : f32
      %12 = vector.broadcast %cst_10 : f32 to vector<32x128xf32>
      %c0_11 = arith.constant 0 : index
      %c0_12 = arith.constant 0 : index
      %13 = vector.load %arg7[%c0_11, %c0_12] : memref<32x128xf32, #tpu.memory_space<vmem>>, vector<32x128xf32>
      tpu.vector_store %arg7[%c0_11, %c0_12], %12 {strides = array<i32>} : memref<32x128xf32, #tpu.memory_space<vmem>>, vector<32x128xf32>,
    } else {
    }
    %c0 = arith.constant 0 : index
    %c0_1 = arith.constant 0 : index
    %3 = vector.load %arg7[%c0, %c0_1] : memref<32x128xf32, #tpu.memory_space<vmem>>, vector<32x128xf32>
    %c0_2 = arith.constant 0 : index
    %c0_3 = arith.constant 0 : index
    %4 = vector.load %arg2[%c0_2, %c0_3] : memref<32x128xbf16, #tpu.memory_space<vmem>>, vector<32x128xbf16>
    %c0_4 = arith.constant 0 : index
    %c0_5 = arith.constant 0 : index
    %5 = vector.load %arg3[%c0_4, %c0_5] : memref<128x128xbf16, #tpu.memory_space<vmem>>, vector<128x128xbf16>
    %cst = arith.constant dense<0.000000e+00> : vector<32x128xf32>
    %6 = tpu.matmul %4, %5, %cst {dimension_numbers = #tpu.dot_dimension_numbers<[1], [0], [0], [1], [0, 0, 1, 1], [], []>} : vector<32x128xbf16>, vector<128x128xbf16>, vector<32x128xf32> -> vector<32x128xf32>
    %7 = arith.addf %3, %6 : vector<32x128xf32>
    %c0_6 = arith.constant 0 : index
    %c0_7 = arith.constant 0 : index
    %8 = vector.load %arg7[%c0_6, %c0_7] : memref<32x128xf32, #tpu.memory_space<vmem>>, vector<32x128xf32>
    tpu.vector_store %arg7[%c0_6, %c0_7], %7 {strides = array<i32>} : memref<32x128xf32, #tpu.memory_space<vmem>>, vector<32x128xf32>,
    %c0_i32_8 = arith.constant 0 : i32
    %9 = arith.cmpi eq, %arg1, %c0_i32_8 : i32
    %10 = arith.extui %9 : i1 to i32
    %c0_i32_9 = arith.constant 0 : i32
    %11 = arith.cmpi ne, %10, %c0_i32_9 : i32
    scf.if %11 {
      %c0_10 = arith.constant 0 : index
      %c0_11 = arith.constant 0 : index
      %12 = vector.load %arg7[%c0_10, %c0_11] : memref<32x128xf32, #tpu.memory_space<vmem>>, vector<32x128xf32>
      %13 = arith.truncf %12 : vector<32x128xf32> to vector<32x128xbf16>
      %c0_12 = arith.constant 0 : index
      %c0_13 = arith.constant 0 : index
      %14 = vector.load %arg4[%c0_12, %c0_13] : memref<32x128xbf16, #tpu.memory_space<vmem>>, vector<32x128xbf16>
      tpu.vector_store %arg4[%c0_12, %c0_13], %13 {strides = array<i32>} : memref<32x128xbf16, #tpu.memory_space<vmem>>, vector<32x128xbf16>,
      %cst_14 = arith.constant dense<0.000000e+00> : vector<128xf32>
      %15 = vector.multi_reduction <add>, %12, %cst_14 [0] : vector<32x128xf32> to vector<128xf32>
      %16 = vector.shape_cast %15 : vector<128xf32> to vector<1x128xf32>
      %17 = arith.mulf %12, %12 : vector<32x128xf32>
      %cst_15 = arith.constant dense<0.000000e+00> : vector<128xf32>
      %18 = vector.multi_reduction <add>, %17, %cst_15 [0] : vector<32x128xf32> to vector<128xf32>
      %19 = vector.shape_cast %18 : vector<128xf32> to vector<1x128xf32>
      %20 = vector.shape_cast %16 : vector<1x128xf32> to vector<1x128xf32>
      %21 = vector.broadcast %20 : vector<1x128xf32> to vector<8x128xf32>
      %c0_16 = arith.constant 0 : index
      %c0_17 = arith.constant 0 : index
      %22 = vector.load %arg5[%c0_16, %c0_17] : memref<8x128xf32, #tpu.memory_space<vmem>>, vector<8x128xf32>
      tpu.vector_store %arg5[%c0_16, %c0_17], %21 {strides = array<i32>} : memref<8x128xf32, #tpu.memory_space<vmem>>, vector<8x128xf32>,
      %23 = vector.shape_cast %19 : vector<1x128xf32> to vector<1x128xf32>
      %24 = vector.broadcast %23 : vector<1x128xf32> to vector<8x128xf32>
      %c0_18 = arith.constant 0 : index
      %c0_19 = arith.constant 0 : index
      %25 = vector.load %arg6[%c0_18, %c0_19] : memref<8x128xf32, #tpu.memory_space<vmem>>, vector<8x128xf32>
      tpu.vector_store %arg6[%c0_18, %c0_19], %24 {strides = array<i32>} : memref<8x128xf32, #tpu.memory_space<vmem>>, vector<8x128xf32>,
    } else {
    }
    return
  }
  func.func @transform_0(%arg0: i32, %arg1: i32) -> (i32, i32) {
    %c0_i32 = arith.constant 0 : i32
    return %arg0, %arg1 : i32, i32
  }
  func.func @transform_1(%arg0: i32, %arg1: i32) -> (i32, i32) {
    %c0_i32 = arith.constant 0 : i32
    %c0_i32_0 = arith.constant 0 : i32
    return %arg1, %c0_i32 : i32, i32
  }
  func.func @transform_2(%arg0: i32, %arg1: i32) -> (i32, i32) {
    %c0_i32 = arith.constant 0 : i32
    %c0_i32_0 = arith.constant 0 : i32
    return %arg0, %c0_i32 : i32, i32
  }
  func.func @transform_3(%arg0: i32, %arg1: i32) -> (i32, i32) {
    %c0_i32 = arith.constant 0 : i32
    %c0_i32_0 = arith.constant 0 : i32
    return %arg0, %c0_i32 : i32, i32
  }
  func.func @transform_4(%arg0: i32, %arg1: i32) -> (i32, i32) {
    %c0_i32 = arith.constant 0 : i32
    %c0_i32_0 = arith.constant 0 : i32
    return %arg0, %c0_i32 : i32, i32
  }
}

module attributes {stable_mosaic.version = 11 : i64} {
  func.func @bn_relu_kernel(%arg0: i32, %arg1: memref<16x128xbf16, #tpu.memory_space<vmem>>, %arg2: memref<1x128xf32, #tpu.memory_space<vmem>>, %arg3: memref<1x128xf32, #tpu.memory_space<vmem>>, %arg4: memref<16x128xbf16, #tpu.memory_space<vmem>>) attributes {dimension_semantics = [#tpu.dimension_semantics<parallel>], iteration_bounds = array<i64: 1>, scalar_prefetch = 0 : i64, scratch_operands = 0 : i64, tpu.core_type = #tpu.core_type<tc>, window_params = [{transform_indices = @transform_0, window_bounds = array<i64: 16, 128>}, {pipeline_mode = #tpu.pipeline_mode<synchronous>, transform_indices = @transform_1, window_bounds = array<i64: 1, 128>}, {pipeline_mode = #tpu.pipeline_mode<synchronous>, transform_indices = @transform_2, window_bounds = array<i64: 1, 128>}, {transform_indices = @transform_3, window_bounds = array<i64: 16, 128>}]} {
    %c0 = arith.constant 0 : index
    %c0_0 = arith.constant 0 : index
    %0 = vector.load %arg1[%c0, %c0_0] : memref<16x128xbf16, #tpu.memory_space<vmem>>, vector<16x128xbf16>
    %1 = arith.extf %0 : vector<16x128xbf16> to vector<16x128xf32>
    %c0_1 = arith.constant 0 : index
    %c0_2 = arith.constant 0 : index
    %2 = vector.load %arg2[%c0_1, %c0_2] : memref<1x128xf32, #tpu.memory_space<vmem>>, vector<1x128xf32>
    %3 = vector.broadcast %2 : vector<1x128xf32> to vector<16x128xf32>
    %4 = arith.mulf %1, %3 : vector<16x128xf32>
    %c0_3 = arith.constant 0 : index
    %c0_4 = arith.constant 0 : index
    %5 = vector.load %arg3[%c0_3, %c0_4] : memref<1x128xf32, #tpu.memory_space<vmem>>, vector<1x128xf32>
    %6 = vector.broadcast %5 : vector<1x128xf32> to vector<16x128xf32>
    %7 = arith.addf %4, %6 : vector<16x128xf32>
    %cst = arith.constant 0.000000e+00 : f32
    %8 = vector.broadcast %cst : f32 to vector<16x128xf32>
    %9 = arith.maximumf %7, %8 : vector<16x128xf32>
    %10 = arith.truncf %9 : vector<16x128xf32> to vector<16x128xbf16>
    %c0_5 = arith.constant 0 : index
    %c0_6 = arith.constant 0 : index
    %11 = vector.load %arg4[%c0_5, %c0_6] : memref<16x128xbf16, #tpu.memory_space<vmem>>, vector<16x128xbf16>
    tpu.vector_store %arg4[%c0_5, %c0_6], %10 {strides = array<i32>} : memref<16x128xbf16, #tpu.memory_space<vmem>>, vector<16x128xbf16>,
    return
  }
  func.func @transform_0(%arg0: i32) -> (i32, i32) {
    %c0_i32 = arith.constant 0 : i32
    %c0_i32_0 = arith.constant 0 : i32
    return %arg0, %c0_i32 : i32, i32
  }
  func.func @transform_1(%arg0: i32) -> (i32, i32) {
    %c0_i32 = arith.constant 0 : i32
    %c0_i32_0 = arith.constant 0 : i32
    %c0_i32_1 = arith.constant 0 : i32
    return %c0_i32, %c0_i32_0 : i32, i32
  }
  func.func @transform_2(%arg0: i32) -> (i32, i32) {
    %c0_i32 = arith.constant 0 : i32
    %c0_i32_0 = arith.constant 0 : i32
    %c0_i32_1 = arith.constant 0 : i32
    return %c0_i32, %c0_i32_0 : i32, i32
  }
  func.func @transform_3(%arg0: i32) -> (i32, i32) {
    %c0_i32 = arith.constant 0 : i32
    %c0_i32_0 = arith.constant 0 : i32
    return %arg0, %c0_i32 : i32, i32
  }
}

module attributes {stable_mosaic.version = 11 : i64} {
  func.func @conv_stats_kernel(%arg0: i32, %arg1: i32, %arg2: memref<16x128xbf16, #tpu.memory_space<vmem>>, %arg3: memref<128x128xbf16, #tpu.memory_space<vmem>>, %arg4: memref<16x128xbf16, #tpu.memory_space<vmem>>, %arg5: memref<8x128xf32, #tpu.memory_space<vmem>>, %arg6: memref<8x128xf32, #tpu.memory_space<vmem>>, %arg7: memref<16x128xf32, #tpu.memory_space<vmem>>) attributes {dimension_semantics = [#tpu.dimension_semantics<parallel>, #tpu.dimension_semantics<arbitrary>], iteration_bounds = array<i64: 1, 1>, scalar_prefetch = 0 : i64, scratch_operands = 1 : i64, tpu.core_type = #tpu.core_type<tc>, window_params = [{transform_indices = @transform_0, window_bounds = array<i64: 16, 128>}, {transform_indices = @transform_1, window_bounds = array<i64: 128, 128>}, {transform_indices = @transform_2, window_bounds = array<i64: 16, 128>}, {transform_indices = @transform_3, window_bounds = array<i64: 8, 128>}, {transform_indices = @transform_4, window_bounds = array<i64: 8, 128>}]} {
    %c0_i32 = arith.constant 0 : i32
    %0 = arith.cmpi eq, %arg1, %c0_i32 : i32
    %1 = arith.extui %0 : i1 to i32
    %c0_i32_0 = arith.constant 0 : i32
    %2 = arith.cmpi ne, %1, %c0_i32_0 : i32
    scf.if %2 {
      %cst_10 = arith.constant 0.000000e+00 : f32
      %12 = vector.broadcast %cst_10 : f32 to vector<16x128xf32>
      %c0_11 = arith.constant 0 : index
      %c0_12 = arith.constant 0 : index
      %13 = vector.load %arg7[%c0_11, %c0_12] : memref<16x128xf32, #tpu.memory_space<vmem>>, vector<16x128xf32>
      tpu.vector_store %arg7[%c0_11, %c0_12], %12 {strides = array<i32>} : memref<16x128xf32, #tpu.memory_space<vmem>>, vector<16x128xf32>,
    } else {
    }
    %c0 = arith.constant 0 : index
    %c0_1 = arith.constant 0 : index
    %3 = vector.load %arg7[%c0, %c0_1] : memref<16x128xf32, #tpu.memory_space<vmem>>, vector<16x128xf32>
    %c0_2 = arith.constant 0 : index
    %c0_3 = arith.constant 0 : index
    %4 = vector.load %arg2[%c0_2, %c0_3] : memref<16x128xbf16, #tpu.memory_space<vmem>>, vector<16x128xbf16>
    %c0_4 = arith.constant 0 : index
    %c0_5 = arith.constant 0 : index
    %5 = vector.load %arg3[%c0_4, %c0_5] : memref<128x128xbf16, #tpu.memory_space<vmem>>, vector<128x128xbf16>
    %cst = arith.constant dense<0.000000e+00> : vector<16x128xf32>
    %6 = tpu.matmul %4, %5, %cst {dimension_numbers = #tpu.dot_dimension_numbers<[1], [0], [0], [1], [0, 0, 1, 1], [], []>} : vector<16x128xbf16>, vector<128x128xbf16>, vector<16x128xf32> -> vector<16x128xf32>
    %7 = arith.addf %3, %6 : vector<16x128xf32>
    %c0_6 = arith.constant 0 : index
    %c0_7 = arith.constant 0 : index
    %8 = vector.load %arg7[%c0_6, %c0_7] : memref<16x128xf32, #tpu.memory_space<vmem>>, vector<16x128xf32>
    tpu.vector_store %arg7[%c0_6, %c0_7], %7 {strides = array<i32>} : memref<16x128xf32, #tpu.memory_space<vmem>>, vector<16x128xf32>,
    %c0_i32_8 = arith.constant 0 : i32
    %9 = arith.cmpi eq, %arg1, %c0_i32_8 : i32
    %10 = arith.extui %9 : i1 to i32
    %c0_i32_9 = arith.constant 0 : i32
    %11 = arith.cmpi ne, %10, %c0_i32_9 : i32
    scf.if %11 {
      %c0_10 = arith.constant 0 : index
      %c0_11 = arith.constant 0 : index
      %12 = vector.load %arg7[%c0_10, %c0_11] : memref<16x128xf32, #tpu.memory_space<vmem>>, vector<16x128xf32>
      %13 = arith.truncf %12 : vector<16x128xf32> to vector<16x128xbf16>
      %c0_12 = arith.constant 0 : index
      %c0_13 = arith.constant 0 : index
      %14 = vector.load %arg4[%c0_12, %c0_13] : memref<16x128xbf16, #tpu.memory_space<vmem>>, vector<16x128xbf16>
      tpu.vector_store %arg4[%c0_12, %c0_13], %13 {strides = array<i32>} : memref<16x128xbf16, #tpu.memory_space<vmem>>, vector<16x128xbf16>,
      %cst_14 = arith.constant dense<0.000000e+00> : vector<128xf32>
      %15 = vector.multi_reduction <add>, %12, %cst_14 [0] : vector<16x128xf32> to vector<128xf32>
      %16 = vector.shape_cast %15 : vector<128xf32> to vector<1x128xf32>
      %17 = arith.mulf %12, %12 : vector<16x128xf32>
      %cst_15 = arith.constant dense<0.000000e+00> : vector<128xf32>
      %18 = vector.multi_reduction <add>, %17, %cst_15 [0] : vector<16x128xf32> to vector<128xf32>
      %19 = vector.shape_cast %18 : vector<128xf32> to vector<1x128xf32>
      %20 = vector.shape_cast %16 : vector<1x128xf32> to vector<1x128xf32>
      %21 = vector.broadcast %20 : vector<1x128xf32> to vector<8x128xf32>
      %c0_16 = arith.constant 0 : index
      %c0_17 = arith.constant 0 : index
      %22 = vector.load %arg5[%c0_16, %c0_17] : memref<8x128xf32, #tpu.memory_space<vmem>>, vector<8x128xf32>
      tpu.vector_store %arg5[%c0_16, %c0_17], %21 {strides = array<i32>} : memref<8x128xf32, #tpu.memory_space<vmem>>, vector<8x128xf32>,
      %23 = vector.shape_cast %19 : vector<1x128xf32> to vector<1x128xf32>
      %24 = vector.broadcast %23 : vector<1x128xf32> to vector<8x128xf32>
      %c0_18 = arith.constant 0 : index
      %c0_19 = arith.constant 0 : index
      %25 = vector.load %arg6[%c0_18, %c0_19] : memref<8x128xf32, #tpu.memory_space<vmem>>, vector<8x128xf32>
      tpu.vector_store %arg6[%c0_18, %c0_19], %24 {strides = array<i32>} : memref<8x128xf32, #tpu.memory_space<vmem>>, vector<8x128xf32>,
    } else {
    }
    return
  }
  func.func @transform_0(%arg0: i32, %arg1: i32) -> (i32, i32) {
    %c0_i32 = arith.constant 0 : i32
    return %arg0, %arg1 : i32, i32
  }
  func.func @transform_1(%arg0: i32, %arg1: i32) -> (i32, i32) {
    %c0_i32 = arith.constant 0 : i32
    %c0_i32_0 = arith.constant 0 : i32
    return %arg1, %c0_i32 : i32, i32
  }
  func.func @transform_2(%arg0: i32, %arg1: i32) -> (i32, i32) {
    %c0_i32 = arith.constant 0 : i32
    %c0_i32_0 = arith.constant 0 : i32
    return %arg0, %c0_i32 : i32, i32
  }
  func.func @transform_3(%arg0: i32, %arg1: i32) -> (i32, i32) {
    %c0_i32 = arith.constant 0 : i32
    %c0_i32_0 = arith.constant 0 : i32
    return %arg0, %c0_i32 : i32, i32
  }
  func.func @transform_4(%arg0: i32, %arg1: i32) -> (i32, i32) {
    %c0_i32 = arith.constant 0 : i32
    %c0_i32_0 = arith.constant 0 : i32
    return %arg0, %c0_i32 : i32, i32
  }
}

</mosaic_0001>

<bundles_post_ra>
// kernel: _forward_impl.9
= control target key start
LH: loop header
LB: loop body
LE: loop exit
PB: predicated region body
PF: predicated region fallthrough
CT: control target
= control target key end

     0   :  { %s222_s0 = inlined_call_operand.vmem [shape: bf16[64,128], index: 0, kind: input, shape index: {}, may-alias: {0,3}]   ;;  %s223_s1 = inlined_call_operand.vmem [shape: f32[1,128], index: 1, kind: input, shape index: {}]   ;;  %s224_s2 = inlined_call_operand.vmem [shape: f32[1,128], index: 2, kind: input, shape index: {}]   ;;  %s225_s3 = inlined_call_operand.vmem [shape: bf16[64,128], index: 3, kind: output, shape index: {}, may-alias: {0,3}]  }
   0x1   :  { %v131_v0 = vld [vmem:[%s222_s0] sm:$0xff]   ;;  %v166_v4 = vld [vmem:[%s222_s0 + $0x8] sm:$0xff]   ;;  %v167_v5 = vld [vmem:[%s222_s0 + $0x10] sm:$0xff]  }
   0x2   :  { %v112_v1 = vld [vmem:[%s223_s1] ss:$0 sm:$0xff]  ;;  %v132_v2 = vunpack.c.l.bf16 %v131_v0  ;;  %v133_v3 = vunpack.c.h.bf16 %v131_v0  ;;  %v168_v6 = vld [vmem:[%s222_s0 + $0x18] sm:$0xff]   ;;  %v136_v8 = vunpack.c.l.bf16 %v166_v4  ;;  %v137_v9 = vunpack.c.h.bf16 %v166_v4 }
   0x3   :  { %v113_v7 = vld [vmem:[%s224_s2] ss:$0 sm:$0xff]  ;;  %v140_v10 = vunpack.c.l.bf16 %v167_v5  ;;  %v141_v11 = vunpack.c.h.bf16 %v167_v5  ;;  %v144_v14 = vunpack.c.l.bf16 %v168_v6  ;;  %v145_v15 = vunpack.c.h.bf16 %v168_v6 }
   0x4   :  { %v37_v12 = vmul.f32 %v132_v2, %v112_v1  ;;  %v38_v13 = vmul.f32 %v133_v3, %v112_v1  ;;  %v39_v16 = vmul.f32 %v136_v8, %v112_v1  ;;  %v40_v17 = vmul.f32 %v137_v9, %v112_v1 }
   0x5   :  { %v41_v18 = vmul.f32 %v140_v10, %v112_v1  ;;  %v42_v19 = vmul.f32 %v141_v11, %v112_v1  ;;  %v43_v22 = vmul.f32 %v144_v14, %v112_v1  ;;  %v44_v23 = vmul.f32 %v145_v15, %v112_v1 }
   0x6   :  { %v52_v20 = vadd.f32 %v113_v7, %v37_v12  ;;  %v53_v21 = vadd.f32 %v113_v7, %v38_v13  ;;  %v54_v24 = vadd.f32 %v113_v7, %v39_v16  ;;  %v55_v25 = vadd.f32 %v113_v7, %v40_v17 }
   0x7   :  { %v56_v26 = vadd.f32 %v113_v7, %v41_v18  ;;  %v57_v27 = vadd.f32 %v113_v7, %v42_v19  ;;  %v58_v30 = vadd.f32 %v113_v7, %v43_v22  ;;  %v59_v31 = vadd.f32 %v113_v7, %v44_v23 }
   0x8   :  { %v60_v28 = vmax.f32 %v52_v20, 0.0  ;;  %v61_v29 = vmax.f32 %v53_v21, 0.0  ;;  %v62_v32 = vmax.f32 %v54_v24, 0.0  ;;  %v63_v33 = vmax.f32 %v55_v25, 0.0 }
   0x9   :  { %v64_v34 = vmax.f32 %v56_v26, 0.0  ;;  %v65_v35 = vmax.f32 %v57_v27, 0.0  ;;  %v66_v37 = vmax.f32 %v58_v30, 0.0  ;;  %v67_v38 = vmax.f32 %v59_v31, 0.0 }
   0xa   :  { %v149_v36 = vpack.c.bf16 %v61_v29, %v60_v28  ;;  %v154_v39 = vpack.c.bf16 %v63_v33, %v62_v32 }
   0xb   :  { %v159_v40 = vpack.c.bf16 %v65_v35, %v64_v34  ;;  %v164_v41 = vpack.c.bf16 %v67_v38, %v66_v37 }
   0xc   :  { %150 = vst [vmem:[%s225_s3] sm:$0xff] %v149_v36   ;;  %169 = vst [vmem:[%s225_s3 + $0x8] sm:$0xff] %v154_v39  }
   0xd   :  { %170 = vst [vmem:[%s225_s3 + $0x10] sm:$0xff] %v159_v40   ;;  %171 = vst [vmem:[%s225_s3 + $0x18] sm:$0xff] %v164_v41  }

// kernel: _forward_impl.8
= control target key start
LH: loop header
LB: loop body
LE: loop exit
PB: predicated region body
PF: predicated region fallthrough
CT: control target
= control target key end

     0   :  { %s505_s1 = inlined_call_operand.vmem [shape: bf16[128,128], index: 1, kind: input, shape index: {}]   ;;  %s506_s0 = inlined_call_operand.vmem [shape: bf16[64,128], index: 0, kind: input, shape index: {}]   ;;  %s507_s2 = inlined_call_operand.vmem [shape: bf16[64,128], index: 2, kind: output, shape index: {0}]   ;;  %s508_s3 = inlined_call_operand.vmem [shape: f32[8,128], index: 3, kind: output, shape index: {1}]   ;;  %s509_s4 = inlined_call_operand.vmem [shape: f32[8,128], index: 4, kind: output, shape index: {2}]  }
   0x1   :  { %v414_v0 = vld [vmem:[%s505_s1] sm:$0xff]   ;;  %v415_v1 = vld [vmem:[%s505_s1 + $0x8] sm:$0xff]   ;;  %v416_v2 = vld [vmem:[%s505_s1 + $0x10] sm:$0xff]  }
   0x2   :  { %374 = vmatprep.subr.bf16.mxu0 %v414_v0  ;;  %398 = vmatprep.subr.bf16.mxu1 %v414_v0  ;;  %v417_v3 = vld [vmem:[%s505_s1 + $0x18] sm:$0xff]   ;;  %v422_v4 = vld [vmem:[%s506_s0] sm:$0xff]   ;;  %v424_v5 = vld [vmem:[%s506_s0 + $0x10] sm:$0xff]  }
   0x3   :  { %375 = vmatpush3.bf16.msra.mxu0 %v414_v0  ;;  %406 = vmatpush3.bf16.msra.mxu1 %v414_v0  ;;  %v418_v6 = vld [vmem:[%s505_s1 + $0x20] sm:$0xff]   ;;  %v419_v7 = vld [vmem:[%s505_s1 + $0x28] sm:$0xff]   ;;  %v420_v8 = vld [vmem:[%s505_s1 + $0x30] sm:$0xff]  }
   0x4   :  { %376 = vmatprep.subr.bf16.mxu0 %v415_v1  ;;  %399 = vmatprep.subr.bf16.mxu1 %v415_v1  ;;  %v421_v9 = vld [vmem:[%s505_s1 + $0x38] sm:$0xff]   ;;  %v423_v10 = vld [vmem:[%s506_s0 + $0x8] sm:$0xff]  }
   0x5   :  { %390 = vmatprep.mubr.bf16.mxu0 %v422_v4  ;;  %394 = vmatprep.mubr.bf16.mxu1 %v424_v5  ;;  %v425_v11 = vld [vmem:[%s506_s0 + $0x18] sm:$0xff]  }
   0x7   :  { %377 = vmatpush3.bf16.msra.mxu0 %v415_v1  ;;  %407 = vmatpush3.bf16.msra.mxu1 %v415_v1 }
   0x8   :  { %378 = vmatprep.subr.bf16.mxu0 %v416_v2  ;;  %400 = vmatprep.subr.bf16.mxu1 %v416_v2 }
   0xb   :  { %379 = vmatpush3.bf16.msra.mxu0 %v416_v2  ;;  %408 = vmatpush3.bf16.msra.mxu1 %v416_v2 }
   0xc   :  { %380 = vmatprep.subr.bf16.mxu0 %v417_v3  ;;  %401 = vmatprep.subr.bf16.mxu1 %v417_v3 }
   0xf   :  { %381 = vmatpush3.bf16.msra.mxu0 %v417_v3  ;;  %409 = vmatpush3.bf16.msra.mxu1 %v417_v3 }
  0x10   :  { %382 = vmatprep.subr.bf16.mxu0 %v418_v6  ;;  %402 = vmatprep.subr.bf16.mxu1 %v418_v6 }
  0x13   :  { %383 = vmatpush3.bf16.msra.mxu0 %v418_v6  ;;  %410 = vmatpush3.bf16.msra.mxu1 %v418_v6 }
  0x14   :  { %384 = vmatprep.subr.bf16.mxu0 %v419_v7  ;;  %403 = vmatprep.subr.bf16.mxu1 %v419_v7 }
  0x17   :  { %385 = vmatpush3.bf16.msra.mxu0 %v419_v7  ;;  %411 = vmatpush3.bf16.msra.mxu1 %v419_v7 }
  0x18   :  { %386 = vmatprep.subr.bf16.mxu0 %v420_v8  ;;  %404 = vmatprep.subr.bf16.mxu1 %v420_v8 }
  0x1b   :  { %387 = vmatpush3.bf16.msra.mxu0 %v420_v8  ;;  %412 = vmatpush3.bf16.msra.mxu1 %v420_v8 }
  0x1c   :  { %388 = vmatprep.subr.bf16.mxu0 %v421_v9  ;;  %405 = vmatprep.subr.bf16.mxu1 %v421_v9 }
  0x1f   :  { %389 = vmatpush3.bf16.msra.mxu0 %v421_v9  ;;  %413 = vmatpush3.bf16.msra.mxu1 %v421_v9 }
  0x22   :  { %391 = vmatmul.mubr.bf16.vlgmr.msra.gmra.mrb[0].mxu0 %v423_v10  ;;  %395 = vmatmul.mubr.bf16.vlgmr.msra.gmra.mrb[0].mxu1 %v425_v11 }
  0xf5   :  { %v392_v12 = vpop.f32.mrb[0].mxu0  ;;  %v396_v13 = vpop.f32.mrb[0].mxu1 }
  0xf6   :  { %v165_v14 = vpop.f32.mrb[1].mxu0  ;;  %v181_v15 = vpop.f32.mrb[1].mxu1  ;;  %v278_v27 = vmul.f32 %v392_v12, %v392_v12  ;;  %v282_v39 = vmul.f32 %v396_v13, %v396_v13 }
  0xf7   :  { %v393_v16 = vpop.f32.mrb[2].mxu0  ;;  %v397_v17 = vpop.f32.mrb[2].mxu1  ;;  %v276_v18 = vmul.f32 %v165_v14, %v165_v14  ;;  %v280_v33 = vmul.f32 %v181_v15, %v181_v15 }
  0xf8   :  { %v347_v19 = vpack.c.bf16 %v393_v16, %v392_v12  ;;  %v168_v20 = vpop.f32.mrb[3].mxu0  ;;  %v357_v21 = vpack.c.bf16 %v397_v17, %v396_v13  ;;  %v184_v22 = vpop.f32.mrb[3].mxu1  ;;  %v279_v30 = vmul.f32 %v393_v16, %v393_v16  ;;  %v283_v42 = vmul.f32 %v397_v17, %v397_v17 }
  0xf9   :  { %v342_v23 = vpack.c.bf16 %v168_v20, %v165_v14  ;;  %v263_v24 = vadd.f32 %v168_v20, %v165_v14  ;;  %v277_v25 = vmul.f32 %v168_v20, %v168_v20  ;;  %v352_v26 = vpack.c.bf16 %v184_v22, %v181_v15 }
  0xfa   :  { %359 = vst [vmem:[%s507_s2 + $0x8] sm:$0xff] %v347_v19   ;;  %361 = vst [vmem:[%s507_s2 + $0x18] sm:$0xff] %v357_v21   ;;  %v281_v38 = vmul.f32 %v184_v22, %v184_v22 }
  0xfb   :  { %343 = vst [vmem:[%s507_s2] sm:$0xff] %v342_v23   ;;  %v264_v28 = vadd.f32 %v392_v12, %v263_v24  ;;  %v284_v29 = vadd.f32 %v277_v25, %v276_v18  ;;  %360 = vst [vmem:[%s507_s2 + $0x10] sm:$0xff] %v352_v26  }
  0xfd   :  { %v285_v31 = vadd.f32 %v284_v29, %v278_v27  ;;  %v265_v32 = vadd.f32 %v393_v16, %v264_v28 }
  0xff   :  { %v266_v34 = vadd.f32 %v265_v32, %v181_v15  ;;  %v286_v35 = vadd.f32 %v285_v31, %v279_v30 }
 0x101   :  { %v287_v36 = vadd.f32 %v286_v35, %v280_v33  ;;  %v267_v37 = vadd.f32 %v266_v34, %v184_v22 }
 0x103   :  { %v268_v40 = vadd.f32 %v396_v13, %v267_v37  ;;  %v288_v41 = vadd.f32 %v287_v36, %v281_v38 }
 0x105   :  { %v269_v43 = vadd.f32 %v397_v17, %v268_v40  ;;  %v289_v44 = vadd.f32 %v288_v41, %v282_v39 }
 0x107   :  { %v270_v45 = vrot.slane %v269_v43, 4  ;;  %v290_v46 = vadd.f32 %v289_v44, %v283_v42 }
 0x109   :  { %v271_v47 = vadd.f32 %v270_v45, %v269_v43  ;;  %v291_v48 = vrot.slane %v290_v46, 4 }
 0x10b   :  { %v272_v49 = vrot.slane %v271_v47, 2  ;;  %v292_v50 = vadd.f32 %v291_v48, %v290_v46 }
 0x10d   :  { %v273_v51 = vadd.f32 %v272_v49, %v271_v47  ;;  %v293_v52 = vrot.slane %v292_v50, 2 }
 0x10f   :  { %v274_v53 = vrot.slane %v273_v51, 1  ;;  %v294_v54 = vadd.f32 %v293_v52, %v292_v50 }
 0x111   :  { %v275_v55 = vadd.f32 %v274_v53, %v273_v51  ;;  %v295_v56 = vrot.slane %v294_v54, 1 }
 0x113   :  { %v296_v57 = vadd.f32 %v295_v56, %v294_v54  ;;  %297 = vst [vmem:[%s508_s3] sm:$0xff] %v275_v55 }
 0x115   :  { %298 = vst [vmem:[%s509_s4] sm:$0xff] %v296_v57 }

// kernel: _forward_impl.11
= control target key start
LH: loop header
LB: loop body
LE: loop exit
PB: predicated region body
PF: predicated region fallthrough
CT: control target
= control target key end

     0   :  { %s140_s0 = inlined_call_operand.vmem [shape: bf16[32,128], index: 0, kind: input, shape index: {}, may-alias: {0,3}]   ;;  %s141_s1 = inlined_call_operand.vmem [shape: f32[1,128], index: 1, kind: input, shape index: {}]   ;;  %s142_s2 = inlined_call_operand.vmem [shape: f32[1,128], index: 2, kind: input, shape index: {}]   ;;  %s143_s3 = inlined_call_operand.vmem [shape: bf16[32,128], index: 3, kind: output, shape index: {}, may-alias: {0,3}]  }
   0x1   :  { %v83_v0 = vld [vmem:[%s140_s0] sm:$0xff]   ;;  %v100_v4 = vld [vmem:[%s140_s0 + $0x8] sm:$0xff]  }
   0x2   :  { %v72_v1 = vld [vmem:[%s141_s1] ss:$0 sm:$0xff]  ;;  %v84_v2 = vunpack.c.l.bf16 %v83_v0  ;;  %v85_v3 = vunpack.c.h.bf16 %v83_v0  ;;  %v88_v6 = vunpack.c.l.bf16 %v100_v4  ;;  %v89_v7 = vunpack.c.h.bf16 %v100_v4 }
   0x3   :  { %v73_v5 = vld [vmem:[%s142_s2] ss:$0 sm:$0xff] }
   0x4   :  { %v29_v8 = vmul.f32 %v84_v2, %v72_v1  ;;  %v30_v9 = vmul.f32 %v85_v3, %v72_v1  ;;  %v31_v10 = vmul.f32 %v88_v6, %v72_v1  ;;  %v32_v11 = vmul.f32 %v89_v7, %v72_v1 }
   0x6   :  { %v40_v12 = vadd.f32 %v73_v5, %v29_v8  ;;  %v41_v13 = vadd.f32 %v73_v5, %v30_v9  ;;  %v42_v14 = vadd.f32 %v73_v5, %v31_v10  ;;  %v43_v15 = vadd.f32 %v73_v5, %v32_v11 }
   0x8   :  { %v44_v16 = vmax.f32 %v40_v12, 0.0  ;;  %v45_v17 = vmax.f32 %v41_v13, 0.0  ;;  %v46_v18 = vmax.f32 %v42_v14, 0.0  ;;  %v47_v19 = vmax.f32 %v43_v15, 0.0 }
   0xa   :  { %v93_v20 = vpack.c.bf16 %v45_v17, %v44_v16  ;;  %v98_v21 = vpack.c.bf16 %v47_v19, %v46_v18 }
   0xc   :  { %94 = vst [vmem:[%s143_s3] sm:$0xff] %v93_v20   ;;  %101 = vst [vmem:[%s143_s3 + $0x8] sm:$0xff] %v98_v21  }

// kernel: _forward_impl.10
= control target key start
LH: loop header
LB: loop body
LE: loop exit
PB: predicated region body
PF: predicated region fallthrough
CT: control target
= control target key end

     0   :  { %s363_s1 = inlined_call_operand.vmem [shape: bf16[128,128], index: 1, kind: input, shape index: {}]   ;;  %s364_s0 = inlined_call_operand.vmem [shape: bf16[32,128], index: 0, kind: input, shape index: {}]   ;;  %s365_s2 = inlined_call_operand.vmem [shape: bf16[32,128], index: 2, kind: output, shape index: {0}]   ;;  %s366_s3 = inlined_call_operand.vmem [shape: f32[8,128], index: 3, kind: output, shape index: {1}]   ;;  %s367_s4 = inlined_call_operand.vmem [shape: f32[8,128], index: 4, kind: output, shape index: {2}]  }
   0x1   :  { %v286_v0 = vld [vmem:[%s363_s1] sm:$0xff]   ;;  %v287_v1 = vld [vmem:[%s363_s1 + $0x8] sm:$0xff]   ;;  %v288_v2 = vld [vmem:[%s363_s1 + $0x10] sm:$0xff]  }
   0x2   :  { %266 = vmatprep.subr.bf16.mxu0 %v286_v0  ;;  %v289_v3 = vld [vmem:[%s363_s1 + $0x18] sm:$0xff]   ;;  %v294_v4 = vld [vmem:[%s364_s0] sm:$0xff]   ;;  %v291_v6 = vld [vmem:[%s363_s1 + $0x28] sm:$0xff]  }
   0x3   :  { %267 = vmatpush3.bf16.msra.mxu0 %v286_v0  ;;  %282 = vmatprep.mubr.bf16.mxu0 %v294_v4  ;;  %v290_v5 = vld [vmem:[%s363_s1 + $0x20] sm:$0xff]   ;;  %v292_v7 = vld [vmem:[%s363_s1 + $0x30] sm:$0xff]   ;;  %v293_v8 = vld [vmem:[%s363_s1 + $0x38] sm:$0xff]  }
   0x4   :  { %268 = vmatprep.subr.bf16.mxu0 %v287_v1  ;;  %v295_v9 = vld [vmem:[%s364_s0 + $0x8] sm:$0xff]  }
   0x7   :  { %269 = vmatpush3.bf16.msra.mxu0 %v287_v1 }
   0x8   :  { %270 = vmatprep.subr.bf16.mxu0 %v288_v2 }
   0xb   :  { %271 = vmatpush3.bf16.msra.mxu0 %v288_v2 }
   0xc   :  { %272 = vmatprep.subr.bf16.mxu0 %v289_v3 }
   0xf   :  { %273 = vmatpush3.bf16.msra.mxu0 %v289_v3 }
  0x10   :  { %274 = vmatprep.subr.bf16.mxu0 %v290_v5 }
  0x13   :  { %275 = vmatpush3.bf16.msra.mxu0 %v290_v5 }
  0x14   :  { %276 = vmatprep.subr.bf16.mxu0 %v291_v6 }
  0x17   :  { %277 = vmatpush3.bf16.msra.mxu0 %v291_v6 }
  0x18   :  { %278 = vmatprep.subr.bf16.mxu0 %v292_v7 }
  0x1b   :  { %279 = vmatpush3.bf16.msra.mxu0 %v292_v7 }
  0x1c   :  { %280 = vmatprep.subr.bf16.mxu0 %v293_v8 }
  0x1f   :  { %281 = vmatpush3.bf16.msra.mxu0 %v293_v8 }
  0x22   :  { %283 = vmatmul.mubr.bf16.vlgmr.msra.gmra.mrb[0].mxu0 %v295_v9 }
  0xf5   :  { %v284_v10 = vpop.f32.mrb[0].mxu0 }
  0xf6   :  { %v141_v11 = vpop.f32.mrb[1].mxu0  ;;  %v202_v19 = vmul.f32 %v284_v10, %v284_v10 }
  0xf7   :  { %v285_v12 = vpop.f32.mrb[2].mxu0  ;;  %v200_v15 = vmul.f32 %v141_v11, %v141_v11 }
  0xf8   :  { %v253_v13 = vpack.c.bf16 %v285_v12, %v284_v10  ;;  %v144_v14 = vpop.f32.mrb[3].mxu0  ;;  %v203_v22 = vmul.f32 %v285_v12, %v285_v12 }
  0xf9   :  { %v248_v16 = vpack.c.bf16 %v144_v14, %v141_v11  ;;  %v191_v17 = vadd.f32 %v144_v14, %v141_v11  ;;  %v201_v18 = vmul.f32 %v144_v14, %v144_v14 }
  0xfa   :  { %255 = vst [vmem:[%s365_s2 + $0x8] sm:$0xff] %v253_v13  }
  0xfb   :  { %249 = vst [vmem:[%s365_s2] sm:$0xff] %v248_v16   ;;  %v192_v20 = vadd.f32 %v284_v10, %v191_v17  ;;  %v204_v21 = vadd.f32 %v201_v18, %v200_v15 }
  0xfd   :  { %v193_v23 = vadd.f32 %v285_v12, %v192_v20  ;;  %v205_v24 = vadd.f32 %v204_v21, %v202_v19 }
  0xff   :  { %v194_v25 = vrot.slane %v193_v23, 4  ;;  %v206_v26 = vadd.f32 %v205_v24, %v203_v22 }
 0x101   :  { %v195_v27 = vadd.f32 %v194_v25, %v193_v23  ;;  %v207_v28 = vrot.slane %v206_v26, 4 }
 0x103   :  { %v196_v29 = vrot.slane %v195_v27, 2  ;;  %v208_v30 = vadd.f32 %v207_v28, %v206_v26 }
 0x105   :  { %v197_v31 = vadd.f32 %v196_v29, %v195_v27  ;;  %v209_v32 = vrot.slane %v208_v30, 2 }
 0x107   :  { %v198_v33 = vrot.slane %v197_v31, 1  ;;  %v210_v34 = vadd.f32 %v209_v32, %v208_v30 }
 0x109   :  { %v199_v35 = vadd.f32 %v198_v33, %v197_v31  ;;  %v211_v36 = vrot.slane %v210_v34, 1 }
 0x10b   :  { %v212_v37 = vadd.f32 %v211_v36, %v210_v34  ;;  %213 = vst [vmem:[%s366_s3] sm:$0xff] %v199_v35 }
 0x10d   :  { %214 = vst [vmem:[%s367_s4] sm:$0xff] %v212_v37 }

// kernel: _forward_impl.13
= control target key start
LH: loop header
LB: loop body
LE: loop exit
PB: predicated region body
PF: predicated region fallthrough
CT: control target
= control target key end

     0   :  { %s99_s0 = inlined_call_operand.vmem [shape: bf16[16,128], index: 0, kind: input, shape index: {}, may-alias: {0,3}]   ;;  %s100_s1 = inlined_call_operand.vmem [shape: f32[1,128], index: 1, kind: input, shape index: {}]   ;;  %s101_s2 = inlined_call_operand.vmem [shape: f32[1,128], index: 2, kind: input, shape index: {}]   ;;  %s102_s3 = inlined_call_operand.vmem [shape: bf16[16,128], index: 3, kind: output, shape index: {}, may-alias: {0,3}]  }
   0x1   :  { %v59_v0 = vld [vmem:[%s99_s0] sm:$0xff]  }
   0x2   :  { %v52_v1 = vld [vmem:[%s100_s1] ss:$0 sm:$0xff]  ;;  %v60_v2 = vunpack.c.l.bf16 %v59_v0  ;;  %v61_v3 = vunpack.c.h.bf16 %v59_v0 }
   0x3   :  { %v53_v4 = vld [vmem:[%s101_s2] ss:$0 sm:$0xff] }
   0x4   :  { %v25_v5 = vmul.f32 %v60_v2, %v52_v1  ;;  %v26_v6 = vmul.f32 %v61_v3, %v52_v1 }
   0x6   :  { %v34_v7 = vadd.f32 %v53_v4, %v25_v5  ;;  %v35_v8 = vadd.f32 %v53_v4, %v26_v6 }
   0x8   :  { %v36_v9 = vmax.f32 %v34_v7, 0.0  ;;  %v37_v10 = vmax.f32 %v35_v8, 0.0 }
   0xa   :  { %v65_v11 = vpack.c.bf16 %v37_v10, %v36_v9 }
   0xc   :  { %66 = vst [vmem:[%s102_s3] sm:$0xff] %v65_v11  }

// kernel: _forward_impl.12
= control target key start
LH: loop header
LB: loop body
LE: loop exit
PB: predicated region body
PF: predicated region fallthrough
CT: control target
= control target key end

     0   :  { %v243_v0 = vmov 0.0   ;;  %vm244_vm0 = vmmov 0   ;;  %s306_s1 = inlined_call_operand.vmem [shape: bf16[128,128], index: 1, kind: input, shape index: {}]   ;;  %s307_s0 = inlined_call_operand.vmem [shape: bf16[16,128], index: 0, kind: input, shape index: {}]   ;;  %s308_s2 = inlined_call_operand.vmem [shape: bf16[16,128], index: 2, kind: output, shape index: {0}]   ;;  %s309_s3 = inlined_call_operand.vmem [shape: f32[8,128], index: 3, kind: output, shape index: {1}]   ;;  %s310_s4 = inlined_call_operand.vmem [shape: f32[8,128], index: 4, kind: output, shape index: {2}]  }
   0x1   :  { %212 = vmatprep.subr.bf16.mxu0 %v243_v0  ;;  %v234_v1 = vld [vmem:[%s306_s1] sm:$0xff]   ;;  %228 = vmatprep.mubr.msk.bf16.mxu0 %vm244_vm0, %v243_v0  ;;  %v235_v2 = vld [vmem:[%s306_s1 + $0x8] sm:$0xff]   ;;  %v236_v3 = vld [vmem:[%s306_s1 + $0x10] sm:$0xff]  }
   0x2   :  { %213 = vmatpush3.bf16.msra.mxu0 %v234_v1  ;;  %v237_v4 = vld [vmem:[%s306_s1 + $0x18] sm:$0xff]   ;;  %v238_v5 = vld [vmem:[%s306_s1 + $0x20] sm:$0xff]   ;;  %v239_v6 = vld [vmem:[%s306_s1 + $0x28] sm:$0xff]  }
   0x3   :  { %214 = vmatprep.subr.bf16.mxu0 %v243_v0  ;;  %v240_v7 = vld [vmem:[%s306_s1 + $0x30] sm:$0xff]   ;;  %v241_v8 = vld [vmem:[%s306_s1 + $0x38] sm:$0xff]   ;;  %v242_v9 = vld [vmem:[%s307_s0] sm:$0xff]  }
   0x6   :  { %215 = vmatpush3.bf16.msra.mxu0 %v235_v2 }
   0x7   :  { %216 = vmatprep.subr.bf16.mxu0 %v243_v0 }
   0xa   :  { %217 = vmatpush3.bf16.msra.mxu0 %v236_v3 }
   0xb   :  { %218 = vmatprep.subr.bf16.mxu0 %v243_v0 }
   0xe   :  { %219 = vmatpush3.bf16.msra.mxu0 %v237_v4 }
   0xf   :  { %220 = vmatprep.subr.bf16.mxu0 %v243_v0 }
  0x12   :  { %221 = vmatpush3.bf16.msra.mxu0 %v238_v5 }
  0x13   :  { %222 = vmatprep.subr.bf16.mxu0 %v243_v0 }
  0x16   :  { %223 = vmatpush3.bf16.msra.mxu0 %v239_v6 }
  0x17   :  { %224 = vmatprep.subr.bf16.mxu0 %v243_v0 }
  0x1a   :  { %225 = vmatpush3.bf16.msra.mxu0 %v240_v7 }
  0x1b   :  { %226 = vmatprep.subr.bf16.mxu0 %v243_v0 }
  0x1e   :  { %227 = vmatpush3.bf16.msra.mxu0 %v241_v8 }
  0x21   :  { %229 = vmatmul.mubr.bf16.vlgmr.msra.gmra.mrb[0].mxu0 %v242_v9 }
  0xf4   :  { %v129_v10 = vpop.f32.mrb[0].mxu0 }
  0xf5   :  { %v230_v11 = vpop.f32.mrb[1].mxu0  ;;  %v162_v13 = vmul.f32 %v129_v10, %v129_v10 }
  0xf6   :  { %v132_v12 = vpop.f32.mrb[2].mxu0 }
  0xf7   :  { %v201_v14 = vpack.c.bf16 %v132_v12, %v129_v10  ;;  %v155_v15 = vadd.f32 %v132_v12, %v129_v10  ;;  %v163_v16 = vmul.f32 %v132_v12, %v132_v12  ;;  %v231_v17 = vpop.f32.mrb[3].mxu0 }
  0xf9   :  { %202 = vst [vmem:[%s308_s2] sm:$0xff] %v201_v14   ;;  %v156_v18 = vrot.slane %v155_v15, 4  ;;  %v164_v19 = vadd.f32 %v163_v16, %v162_v13 }
  0xfb   :  { %v157_v20 = vadd.f32 %v156_v18, %v155_v15  ;;  %v165_v21 = vrot.slane %v164_v19, 4 }
  0xfd   :  { %v158_v22 = vrot.slane %v157_v20, 2  ;;  %v166_v23 = vadd.f32 %v165_v21, %v164_v19 }
  0xff   :  { %v159_v24 = vadd.f32 %v158_v22, %v157_v20  ;;  %v167_v25 = vrot.slane %v166_v23, 2 }
 0x101   :  { %v160_v26 = vrot.slane %v159_v24, 1  ;;  %v168_v27 = vadd.f32 %v167_v25, %v166_v23 }
 0x103   :  { %v161_v28 = vadd.f32 %v160_v26, %v159_v24  ;;  %v169_v29 = vrot.slane %v168_v27, 1 }
 0x105   :  { %v170_v30 = vadd.f32 %v169_v29, %v168_v27  ;;  %171 = vst [vmem:[%s309_s3] sm:$0xff] %v161_v28 }
 0x107   :  { %172 = vst [vmem:[%s310_s4] sm:$0xff] %v170_v30 }

</bundles_post_ra>
